<compile_context>
chip_gen: v5e
topology: v5e:2x2
jax: 0.10.0
libtpu: 0.0.40
codegen_flags: <defaults>
</compile_context>

<pallas_src>
import functools

import jax
import jax.numpy as jnp
from jax.experimental import pallas as pl
from jax.experimental.pallas import tpu as pltpu


def _gelu_exact(v):
    # matches the PyTorch graph: v*0.5 * (erf(v*0.7071067811865476) + 1)
    return (v * 0.5) * (jax.lax.erf(v * 0.7071067811865476) + 1.0)


def _gelu_tanh(v):
    # EUP-friendly approximation (only used with approximate_gelu=True)
    return 0.5 * v * (1.0 + jnp.tanh(0.7978845608028654 * (v + 0.044715 * v * v * v)))


def _conv1x1_gelu_kernel(x_ref, w_ref, b_ref, o_ref, *, nb, cin, cout, exact):
    # x_ref: (nb*cin, TW)  spatial-lane tile (lanes dense, multiple of 128)
    # w_ref: (cout, cin)   VMEM-resident weights (constant index_map)
    # b_ref: (cout, 1)     VMEM-resident bias column
    # o_ref: (nb*cout, TW) lane-dense output tile (dense sublanes)
    x = x_ref[...].astype(jnp.float32)
    w = w_ref[...].astype(jnp.float32)
    b = b_ref[...].astype(jnp.float32)
    act = _gelu_exact if exact else _gelu_tanh
    for n in range(nb):                       # unrolled over batch-in-block
        acc = b                               # (cout, 1), broadcasts below
        for ci in range(cin):                 # unrolled VPU broadcast-FMA chain
            acc = acc + w[:, ci:ci + 1] * x[n * cin + ci:n * cin + ci + 1, :]
        o_ref[n * cout:(n + 1) * cout, :] = act(acc).astype(o_ref.dtype)


def _round_up(a, m):
    return -(-a // m) * m


def _pick_tile(hw, batch_grid_steps, max_tile=16384):
    """Lane tile width: multiple of 128, bounded, >=2 parallel steps for v7x."""
    hw128 = _round_up(hw, 128)
    tw = min(hw128, max_tile)
    if batch_grid_steps < 2 and hw128 >= 2 * 128:
        want_blocks = min(4, hw128 // 128)    # aim for >=4 lane blocks
        tw = min(tw, _round_up(-(-hw128 // want_blocks), 128))
    return tw


@functools.partial(jax.jit, static_argnames=("padding", "approximate_gelu"))
def conv1x1_gelu(x_nchw, weight, bias, padding=1, approximate_gelu=False):
    """x_nchw: (N, Cin, H, W); weight: (Cout, Cin) or (Cout, Cin, 1, 1); bias: (Cout,)."""
    N, Cin, H, W = x_nchw.shape
    if weight.ndim == 4:                      # PyTorch Conv2d stores (Cout, Cin, 1, 1)
        weight = weight.reshape(weight.shape[0], weight.shape[1])
    Cout, wc = weight.shape
    assert wc == Cin, f"weight Cin {wc} != input Cin {Cin}"

    out_dtype = x_nchw.dtype
    Hp, Wp = H + 2 * padding, W + 2 * padding
    # Zero-pad the (small, Cin-channel) input once; the 1x1 conv of the padded
    # input then *is* the final padded output (border pixels = GELU(bias)).
    if padding:
        x_p = jnp.pad(x_nchw, ((0, 0), (0, 0), (padding, padding), (padding, padding)))
    else:
        x_p = x_nchw
    HW = Hp * Wp

    w = weight.astype(jnp.float32)
    b_col = bias.astype(jnp.float32).reshape(Cout, 1)

    fold_batch = (N * Cout) <= 32             # small batch -> batch on sublanes
    batch_grid_steps = 1 if fold_batch else N
    TW = _pick_tile(HW, batch_grid_steps)
    hw_blocks = -(-HW // TW)                  # cdiv; ragged tail masked by Pallas

    cost = pl.CostEstimate(
        flops=int((2 * Cin + 6) * N * Cout * HW),
        transcendentals=int(N * Cout * HW),
        bytes_accessed=int(x_p.size * x_p.dtype.itemsize
                           + N * Cout * HW * jnp.dtype(out_dtype).itemsize
                           + (w.size + Cout) * 4),
    )

    if fold_batch:
        # free reshape (no transpose): (N, Cin, Hp, Wp) -> (N*Cin, Hp*Wp)
        x_mat = x_p.reshape(N * Cin, HW)
        kernel = functools.partial(_conv1x1_gelu_kernel, nb=N, cin=Cin,
                                   cout=Cout, exact=not approximate_gelu)
        out_flat = pl.pallas_call(
            kernel,
            out_shape=jax.ShapeDtypeStruct((N * Cout, HW), out_dtype),
            grid=(hw_blocks,),
            in_specs=[
                pl.BlockSpec((N * Cin, TW), lambda j: (0, j)),
                pl.BlockSpec((Cout, Cin), lambda j: (0, 0)),
                pl.BlockSpec((Cout, 1), lambda j: (0, 0)),
            ],
            out_specs=pl.BlockSpec((N * Cout, TW), lambda j: (0, j)),
            compiler_params=pltpu.CompilerParams(
                dimension_semantics=("parallel",)),
            cost_estimate=cost,
        )(x_mat, w, b_col)
        return out_flat.reshape(N, Cout, Hp, Wp)

    # larger batches: grid over (N, lane blocks), one batch element per block
    x_mat = x_p.reshape(N, Cin, HW)
    kernel = functools.partial(_conv1x1_gelu_kernel, nb=1, cin=Cin,
                               cout=Cout, exact=not approximate_gelu)
    out3 = pl.pallas_call(
        kernel,
        out_shape=jax.ShapeDtypeStruct((N, Cout, HW), out_dtype),
        grid=(N, hw_blocks),
        in_specs=[
            pl.BlockSpec((None, Cin, TW), lambda n, j: (n, 0, j)),
            pl.BlockSpec((Cout, Cin), lambda n, j: (0, 0)),
            pl.BlockSpec((Cout, 1), lambda n, j: (0, 0)),
        ],
        out_specs=pl.BlockSpec((None, Cout, TW), lambda n, j: (n, 0, j)),
        compiler_params=pltpu.CompilerParams(
            dimension_semantics=("parallel", "parallel")),
        cost_estimate=cost,
    )(x_mat, w, b_col)
    return out3.reshape(N, Cout, Hp, Wp)


if __name__ == "__main__":
    key = jax.random.PRNGKey(0)
    kx, kw, kb = jax.random.split(key, 3)

    # Small shapes consistent with the module: Conv2d(3 -> 8, kernel 1, padding 1)
    N, Cin, H, W = 2, 3, 16, 16
    Cout = 8

    x = jax.random.normal(kx, (N, Cin, H, W), dtype=jnp.float32)
    # deterministic PyTorch-style uniform init, bound = 1/sqrt(fan_in)
    bound = 1.0 / (Cin ** 0.5)
    weight = jax.random.uniform(kw, (Cout, Cin, 1, 1), minval=-bound,
                                maxval=bound, dtype=jnp.float32)
    bias = jax.random.uniform(kb, (Cout,), minval=-bound, maxval=bound,
                              dtype=jnp.float32)

    out = conv1x1_gelu(x, weight, bias, padding=1)
    out = jax.block_until_ready(out)

    # sanity check against a pure-JAX reference (exact-erf GELU)
    xp = jnp.pad(x, ((0, 0), (0, 0), (1, 1), (1, 1)))
    v1 = jnp.einsum('nchw,oc->nohw', xp, weight.reshape(Cout, Cin)) \
        + bias[None, :, None, None]
    ref = (v1 * 0.5) * (jax.lax.erf(v1 * 0.7071067811865476) + 1.0)
    assert out.shape == (N, Cout, H + 2, W + 2)
    assert jnp.allclose(out, ref, atol=1e-5, rtol=1e-5)

    print("KERNEL_OK")
</pallas_src>

<mosaic_0001>
module attributes {stable_mosaic.version = 11 : i64} {
  func.func @_conv1x1_gelu_kernel(%arg0: i32, %arg1: memref<6x128xf32, #tpu.memory_space<vmem>>, %arg2: memref<8x3xf32, #tpu.memory_space<vmem>>, %arg3: memref<8x1xf32, #tpu.memory_space<vmem>>, %arg4: memref<16x128xf32, #tpu.memory_space<vmem>>) attributes {dimension_semantics = [#tpu.dimension_semantics<parallel>], iteration_bounds = array<i64: 3>, scalar_prefetch = 0 : i64, scratch_operands = 0 : i64, tpu.core_type = #tpu.core_type<tc>, window_params = [{transform_indices = @transform_0, window_bounds = array<i64: 6, 128>}, {pipeline_mode = #tpu.pipeline_mode<synchronous>, transform_indices = @transform_1, window_bounds = array<i64: 8, 3>}, {pipeline_mode = #tpu.pipeline_mode<synchronous>, transform_indices = @transform_2, window_bounds = array<i64: 8, 1>}, {transform_indices = @transform_3, window_bounds = array<i64: 16, 128>}]} {
    %c0 = arith.constant 0 : index
    %c0_0 = arith.constant 0 : index
    %0 = vector.load %arg1[%c0, %c0_0] : memref<6x128xf32, #tpu.memory_space<vmem>>, vector<6x128xf32>
    %c0_1 = arith.constant 0 : index
    %c0_2 = arith.constant 0 : index
    %1 = vector.load %arg2[%c0_1, %c0_2] : memref<8x3xf32, #tpu.memory_space<vmem>>, vector<8x3xf32>
    %c0_3 = arith.constant 0 : index
    %c0_4 = arith.constant 0 : index
    %2 = vector.load %arg3[%c0_3, %c0_4] : memref<8x1xf32, #tpu.memory_space<vmem>>, vector<8x1xf32>
    %3 = vector.extract_strided_slice %1 {offsets = [0, 0], sizes = [8, 1], strides = [1, 1]} : vector<8x3xf32> to vector<8x1xf32>
    %4 = vector.extract_strided_slice %0 {offsets = [0, 0], sizes = [1, 128], strides = [1, 1]} : vector<6x128xf32> to vector<1x128xf32>
    %5 = vector.broadcast %3 : vector<8x1xf32> to vector<8x128xf32>
    %6 = vector.broadcast %4 : vector<1x128xf32> to vector<8x128xf32>
    %7 = arith.mulf %5, %6 : vector<8x128xf32>
    %8 = vector.broadcast %2 : vector<8x1xf32> to vector<8x128xf32>
    %9 = arith.addf %8, %7 : vector<8x128xf32>
    %10 = vector.extract_strided_slice %1 {offsets = [0, 1], sizes = [8, 1], strides = [1, 1]} : vector<8x3xf32> to vector<8x1xf32>
    %11 = vector.extract_strided_slice %0 {offsets = [1, 0], sizes = [1, 128], strides = [1, 1]} : vector<6x128xf32> to vector<1x128xf32>
    %12 = vector.broadcast %10 : vector<8x1xf32> to vector<8x128xf32>
    %13 = vector.broadcast %11 : vector<1x128xf32> to vector<8x128xf32>
    %14 = arith.mulf %12, %13 : vector<8x128xf32>
    %15 = arith.addf %9, %14 : vector<8x128xf32>
    %16 = vector.extract_strided_slice %1 {offsets = [0, 2], sizes = [8, 1], strides = [1, 1]} : vector<8x3xf32> to vector<8x1xf32>
    %17 = vector.extract_strided_slice %0 {offsets = [2, 0], sizes = [1, 128], strides = [1, 1]} : vector<6x128xf32> to vector<1x128xf32>
    %18 = vector.broadcast %16 : vector<8x1xf32> to vector<8x128xf32>
    %19 = vector.broadcast %17 : vector<1x128xf32> to vector<8x128xf32>
    %20 = arith.mulf %18, %19 : vector<8x128xf32>
    %21 = arith.addf %15, %20 : vector<8x128xf32>
    %cst = arith.constant 5.000000e-01 : f32
    %22 = vector.broadcast %cst : f32 to vector<8x128xf32>
    %23 = arith.mulf %21, %22 : vector<8x128xf32>
    %cst_5 = arith.constant 0.707106769 : f32
    %24 = vector.broadcast %cst_5 : f32 to vector<8x128xf32>
    %25 = arith.mulf %21, %24 : vector<8x128xf32>
    %26 = math.erf %25 : vector<8x128xf32>
    %cst_6 = arith.constant 1.000000e+00 : f32
    %27 = vector.broadcast %cst_6 : f32 to vector<8x128xf32>
    %28 = arith.addf %26, %27 : vector<8x128xf32>
    %29 = arith.mulf %23, %28 : vector<8x128xf32>
    %c0_7 = arith.constant 0 : index
    %c0_8 = arith.constant 0 : index
    %30 = vector.load %arg4[%c0_7, %c0_8] : memref<16x128xf32, #tpu.memory_space<vmem>>, vector<8x128xf32>
    tpu.vector_store %arg4[%c0_7, %c0_8], %29 {strides = array<i32>} : memref<16x128xf32, #tpu.memory_space<vmem>>, vector<8x128xf32>,
    %31 = vector.extract_strided_slice %1 {offsets = [0, 0], sizes = [8, 1], strides = [1, 1]} : vector<8x3xf32> to vector<8x1xf32>
    %32 = vector.extract_strided_slice %0 {offsets = [3, 0], sizes = [1, 128], strides = [1, 1]} : vector<6x128xf32> to vector<1x128xf32>
    %33 = vector.broadcast %31 : vector<8x1xf32> to vector<8x128xf32>
    %34 = vector.broadcast %32 : vector<1x128xf32> to vector<8x128xf32>
    %35 = arith.mulf %33, %34 : vector<8x128xf32>
    %36 = vector.broadcast %2 : vector<8x1xf32> to vector<8x128xf32>
    %37 = arith.addf %36, %35 : vector<8x128xf32>
    %38 = vector.extract_strided_slice %1 {offsets = [0, 1], sizes = [8, 1], strides = [1, 1]} : vector<8x3xf32> to vector<8x1xf32>
    %39 = vector.extract_strided_slice %0 {offsets = [4, 0], sizes = [1, 128], strides = [1, 1]} : vector<6x128xf32> to vector<1x128xf32>
    %40 = vector.broadcast %38 : vector<8x1xf32> to vector<8x128xf32>
    %41 = vector.broadcast %39 : vector<1x128xf32> to vector<8x128xf32>
    %42 = arith.mulf %40, %41 : vector<8x128xf32>
    %43 = arith.addf %37, %42 : vector<8x128xf32>
    %44 = vector.extract_strided_slice %1 {offsets = [0, 2], sizes = [8, 1], strides = [1, 1]} : vector<8x3xf32> to vector<8x1xf32>
    %45 = vector.extract_strided_slice %0 {offsets = [5, 0], sizes = [1, 128], strides = [1, 1]} : vector<6x128xf32> to vector<1x128xf32>
    %46 = vector.broadcast %44 : vector<8x1xf32> to vector<8x128xf32>
    %47 = vector.broadcast %45 : vector<1x128xf32> to vector<8x128xf32>
    %48 = arith.mulf %46, %47 : vector<8x128xf32>
    %49 = arith.addf %43, %48 : vector<8x128xf32>
    %cst_9 = arith.constant 5.000000e-01 : f32
    %50 = vector.broadcast %cst_9 : f32 to vector<8x128xf32>
    %51 = arith.mulf %49, %50 : vector<8x128xf32>
    %cst_10 = arith.constant 0.707106769 : f32
    %52 = vector.broadcast %cst_10 : f32 to vector<8x128xf32>
    %53 = arith.mulf %49, %52 : vector<8x128xf32>
    %54 = math.erf %53 : vector<8x128xf32>
    %cst_11 = arith.constant 1.000000e+00 : f32
    %55 = vector.broadcast %cst_11 : f32 to vector<8x128xf32>
    %56 = arith.addf %54, %55 : vector<8x128xf32>
    %57 = arith.mulf %51, %56 : vector<8x128xf32>
    %c8 = arith.constant 8 : index
    %c0_12 = arith.constant 0 : index
    %58 = vector.load %arg4[%c8, %c0_12] : memref<16x128xf32, #tpu.memory_space<vmem>>, vector<8x128xf32>
    tpu.vector_store %arg4[%c8, %c0_12], %57 {strides = array<i32>} : memref<16x128xf32, #tpu.memory_space<vmem>>, vector<8x128xf32>,
    return
  }
  func.func @transform_0(%arg0: i32) -> (i32, i32) {
    %c0_i32 = arith.constant 0 : i32
    %c0_i32_0 = arith.constant 0 : i32
    return %c0_i32, %arg0 : i32, i32
  }
  func.func @transform_1(%arg0: i32) -> (i32, i32) {
    %c0_i32 = arith.constant 0 : i32
    %c0_i32_0 = arith.constant 0 : i32
    %c0_i32_1 = arith.constant 0 : i32
    return %c0_i32, %c0_i32_0 : i32, i32
  }
  func.func @transform_2(%arg0: i32) -> (i32, i32) {
    %c0_i32 = arith.constant 0 : i32
    %c0_i32_0 = arith.constant 0 : i32
    %c0_i32_1 = arith.constant 0 : i32
    return %c0_i32, %c0_i32_0 : i32, i32
  }
  func.func @transform_3(%arg0: i32) -> (i32, i32) {
    %c0_i32 = arith.constant 0 : i32
    %c0_i32_0 = arith.constant 0 : i32
    return %c0_i32, %arg0 : i32, i32
  }
}

</mosaic_0001>

<bundles_post_ra>
// kernel: conv1x1_gelu.1
= control target key start
LH: loop header
LB: loop body
LE: loop exit
PB: predicated region body
PF: predicated region fallthrough
CT: control target
= control target key end

     0   :  { %s482_s12 = smov 0   ;;  %s484_s13 = smov 0   ;;  %s557_s0 = inlined_call_operand.vmem [shape: f32[6,324], index: 0, kind: input, shape index: {}]   ;;  %s558_s1 = inlined_call_operand.vmem [shape: f32[8,3], index: 1, kind: input, shape index: {}]   ;;  %s559_s2 = inlined_call_operand.vmem [shape: f32[8,1], index: 2, kind: input, shape index: {}]   ;;  %s560_s3 = inlined_call_operand.vmem [shape: f32[16,324], index: 3, kind: output, shape index: {}]  }
   0x1   :  { %s486_s14 = smov 0  }
   0x2 LB: > { %s495_s15 = sadd.s32 4294967295, %s457_s14   ;;  %s497_s16 = sadd.s32 1, %s457_s14   ;;  %s457_s14 = sphi %s486_s14, %s564_s14   ;;  %s453_s13 = sphi %s484_s13, %s563_s13   ;;  %s449_s12 = sphi %s482_s12, %s562_s12  }
   0x3   : > { %s85_s17 = ssub.s32 %s457_s14, %s497_s16  ;;  %s88_s18 = sadd.s32 1, %s453_s13 }
   0x4   : > { %p86_p0 = scmp.eq.s32.totalorder %s85_s17, 0  ;;  %p98_p1 = scmp.ne.s32.totalorder %s453_s13, %s449_s12 }
   0x5   : > { %p99_p2 = scmp.eq.s32.totalorder %s495_s15, 2  ;;  %p391_p3 = scmp.ge.s32.totalorder %s457_s14, 1 }
   0x6   : > { %s505_s19 = scalar_select %p86_p0, %s453_s13, %s88_s18  }
   0x7   : > { %p507_p4 = por %p99_p2, %p98_p1  ;;  %p136_p5 = scmp.lt.s32.totalorder %s457_s14, 4 }
   0x9   : > { %p137_p6 = pnand %p391_p3, %p136_p5 }
   0xa   : > { %p158_p7 = scmp.lt.s32.totalorder (!%p137_p6), %s495_s15, 2  ;;  %s155_s30 = sand.u32 (!%p137_p6), 1, %s449_s12  }
   0xb   : > { %140 = sbr.rel (%p137_p6) target bundleno = 208 (0xd0), region = 32  ;;  %s392_s4 = sshll.u32 (!%p137_p6), %s155_s30, 4 }
   0xc   : > { %s157_s5 = scalar_lea.vmem (!%p137_p6), [#allocation2], %s392_s4 }
  0x10   : > { %v163_v0 = vld [vmem:[%s558_s1] sm:$0xff]  ;;  %v459_v1 = vmov 0   ;;  %v460_v2 = vmov 1   ;;  %v461_v4 = vmov 2   ;;  %s159_s25 = scalar_select %p158_p7, %s495_s15, 2 }
  0x11   : > { %427 = vset.pattern.permute.xlu0 %v459_v1  ;;  %428 = vset.pattern.permute.xlu1 %v460_v2  ;;  %v164_v3 = vld [vmem:[%s559_s2] sm:$0xff]  ;;  %s397_s6 = sshll.u32 (%p507_p4), %s495_s15, 3 }
  0x12   : > { %167 = vperm.xlu0 %427, %v163_v0   ;;  %179 = vperm.xlu1 %428, %v163_v0   ;;  %s393_s26 = sshll.u32 %s159_s25, 3  ;;  %s299_s9 = scalar_lea.vmem (%p507_p4), %s560_s3, %s397_s6 }
  0x13   : > { %s161_s29 = scalar_lea.vmem %s557_s0, %s393_s26 }
  0x14   : > { %v162_v6 = vld [vmem:[%s161_s29] sm:$0x3f] }
  0x15   : > { %v170_v8 = vperm.slane %v162_v6, 0  ;;  %v237_v9 = vperm.slane %v162_v6, 3  ;;  %v182_v10 = vperm.slane %v162_v6, 1  ;;  %v240_v11 = vperm.slane %v162_v6, 4 }
  0x16   : > { %v189_v12 = vperm.slane %v162_v6, 2  ;;  %v243_v13 = vperm.slane %v162_v6, 5 }
  0x1a   : > { %174 = vperm.xlu0 %427, %v164_v3   ;;  %429 = vset.pattern.permute.xlu1 %v461_v4 }
  0x1b   : > { %186 = vperm.xlu1 %429, %v163_v0  }
  0x22   : > { %430 = vset.pattern.permute.xlu0 %v461_v4 }
  0x84   : > { %v168_v5 = vpop.permute.xlu0 %167  ;;  %v180_v7 = vpop.permute.xlu1 %179 }
  0x85   : > { %v171_v14 = vmul.f32 %v170_v8, %v168_v5  ;;  %v238_v15 = vmul.f32 %v237_v9, %v168_v5  ;;  %v183_v17 = vmul.f32 %v182_v10, %v180_v7  ;;  %v241_v18 = vmul.f32 %v240_v11, %v180_v7 }
  0x8c   : > { %v175_v16 = vpop.permute.xlu0 %174 }
  0x8d   : > { %v177_v19 = vadd.f32 %v175_v16, %v171_v14  ;;  %v239_v20 = vadd.f32 %v238_v15, %v175_v16  ;;  %v187_v21 = vpop.permute.xlu1 %186 }
  0x8e   : > { %v190_v22 = vmul.f32 %v189_v12, %v187_v21  ;;  %v244_v23 = vmul.f32 %v243_v13, %v187_v21 }
  0x8f   : > { %v184_v24 = vadd.f32 %v183_v17, %v177_v19  ;;  %v242_v25 = vadd.f32 %v241_v18, %v239_v20 }
  0x91   : > { %v522_v26 = vadd.f32 %v190_v22, %v184_v24  ;;  %v524_v27 = vadd.f32 %v244_v23, %v242_v25 }
  0x93   : > { %v527_v28 = vmul.f32 0.70710677, %v522_v26  ;;  %v530_v29 = vmul.f32 0.70710677, %v524_v27 }
  0x95   : > { %v194_v30 = vmul.f32 %v527_v28, %v527_v28  ;;  %v248_v31 = vmul.f32 %v530_v29, %v530_v29 }
  0x97   : > { %v195_v32 = vmin.f32 %v194_v30, 16.0  ;;  %v249_v33 = vmin.f32 %v248_v31, 16.0 }
  0x99   : > { %v196_v34 = vmul.f32 2.1237322e-06, %v195_v32  ;;  %v207_v35 = vmul.f32 3.8918573e-05, %v195_v32  ;;  %v250_v36 = vmul.f32 2.1237322e-06, %v249_v33 }
  0x9a   : > { %v261_v37 = vmul.f32 3.8918573e-05, %v249_v33 }
  0x9b   : > { %v197_v38 = vadd.f32 0.00028619796, %v196_v34  ;;  %v208_v39 = vadd.f32 0.001143296, %v207_v35  ;;  %v251_v40 = vadd.f32 0.00028619796, %v250_v36 }
  0x9c   : > { %v262_v41 = vadd.f32 0.001143296, %v261_v37 }
  0x9d   : > { %v198_v42 = vmul.f32 %v197_v38, %v195_v32  ;;  %v209_v43 = vmul.f32 %v208_v39, %v195_v32  ;;  %v252_v44 = vmul.f32 %v251_v40, %v249_v33  ;;  %v192_v40 = vmul.f32 0.5, %v522_v26 }
  0x9e   : > { %v263_v45 = vmul.f32 %v262_v41, %v249_v33 }
  0x9f   : > { %v199_v46 = vadd.f32 0.0036580483, %v198_v42  ;;  %v210_v47 = vadd.f32 0.014752088, %v209_v43  ;;  %v253_v50 = vadd.f32 0.0036580483, %v252_v44 }
  0xa0   : > { %v264_v48 = vadd.f32 0.014752088, %v263_v45 }
  0xa1   : > { %v211_v49 = vmul.f32 %v210_v47, %v195_v32  ;;  %v200_v52 = vmul.f32 %v199_v46, %v195_v32  ;;  %v254_v56 = vmul.f32 %v253_v50, %v249_v33 }
  0xa2   : > { %v265_v51 = vmul.f32 %v264_v48, %v249_v33 }
  0xa3   : > { %v212_v53 = vadd.f32 0.112945676, %v211_v49  ;;  %v201_v58 = vadd.f32 0.05243302, %v200_v52  ;;  %v255_v62 = vadd.f32 0.05243302, %v254_v56 }
  0xa4   : > { %v266_v54 = vadd.f32 0.112945676, %v265_v51 }
  0xa5   : > { %v213_v55 = vmul.f32 %v212_v53, %v195_v32  ;;  %v202_v0 = vmul.f32 %v201_v58, %v195_v32  ;;  %v256_v3 = vmul.f32 %v255_v62, %v249_v33 }
  0xa6   : > { %v267_v57 = vmul.f32 %v266_v54, %v249_v33 }
  0xa7   : > { %v214_v59 = vadd.f32 0.4994258, %v213_v55  ;;  %v203_v4 = vadd.f32 0.18741608, %v202_v0  ;;  %v257_v5 = vadd.f32 0.18741608, %v256_v3 }
  0xa8   : > { %v268_v60 = vadd.f32 0.4994258, %v267_v57 }
  0xa9   : > { %v215_v61 = vmul.f32 %v214_v59, %v195_v32  ;;  %v204_v7 = vmul.f32 %v203_v4, %v195_v32  ;;  %v258_v10 = vmul.f32 %v257_v5, %v249_v33 }
  0xaa   : > { %v269_v63 = vmul.f32 %v268_v60, %v249_v33 }
  0xab   : > { %v216_v1 = vadd.f32 1.0, %v215_v61  ;;  %v205_v13 = vadd.f32 1.1283791, %v204_v7  ;;  %v259_v19 = vadd.f32 1.1283791, %v258_v10 }
  0xac   : > { %v270_v2 = vadd.f32 1.0, %v269_v63 }
  0xad   : > { %431 = vrcp.f32 %v216_v1  ;;  %v228_v14 = vand.u32 2147483648, %v216_v1  ;;  %v226_v17 = vand.u32 2147483647, %v216_v1  ;;  %vm222_vm2 = vweird.f32 %v216_v1 }
  0xae   : > { %433 = vrcp.f32 %v270_v2  ;;  %v282_v18 = vand.u32 2147483648, %v270_v2  ;;  %v280_v21 = vand.u32 2147483647, %v270_v2  ;;  %vm276_vm4 = vweird.f32 %v270_v2 }
  0xaf   : > { %v229_v23 = vor.u32 1.1754944e-38, %v228_v14  ;;  %v206_v25 = vmul.f32 %v205_v13, %v527_v28  ;;  %vm227_vm5 = vcmp.eq.f32.partialorder %v226_v17, 8.507059e+37  ;;  %v260_v33 = vmul.f32 %v259_v19, %v530_v29 }
  0xb0   : > { %v283_v31 = vor.u32 1.1754944e-38, %v282_v18  ;;  %vm281_vm7 = vcmp.eq.f32.partialorder %v280_v21, 8.507059e+37  ;;  %v246_v28 = vmul.f32 0.5, %v524_v27 }
  0xb3   : > { %v432_v6 = vpop.eup %431 }
  0xb4   : > { %v434_v8 = vpop.eup %433  ;;  %v218_v9 = vmul.f32 %v432_v6, %v216_v1  ;;  %vm223_vm0 = vweird.f32 %v432_v6 }
  0xb5   : > { %v272_v11 = vmul.f32 %v434_v8, %v270_v2  ;;  %vm277_vm1 = vweird.f32 %v434_v8  ;;  %vm224_vm3 = vmor %vm222_vm2, %vm223_vm0 }
  0xb6   : > { %v219_v12 = vsub.f32 1.0, %v218_v9  ;;  %vm278_vm6 = vmor %vm276_vm4, %vm277_vm1 }
  0xb7   : > { %v273_v15 = vsub.f32 1.0, %v272_v11 }
  0xb8   : > { %v220_v16 = vmul.f32 %v432_v6, %v219_v12 }
  0xb9   : > { %v274_v20 = vmul.f32 %v434_v8, %v273_v15 }
  0xba   : > { %v221_v22 = vadd.f32 %v432_v6, %v220_v16 }
  0xbb   : > { %v275_v24 = vadd.f32 %v434_v8, %v274_v20 }
  0xbc   : > { %v225_v30 = vsel %vm224_vm3, %v432_v6, %v221_v22 }
  0xbd   : > { %v230_v32 = vsel %vm227_vm5, %v229_v23, %v225_v30  ;;  %v279_v34 = vsel %vm278_vm6, %v434_v8, %v275_v24 }
  0xbe   : > { %v231_v35 = vmul.f32 %v230_v32, %v206_v25  ;;  %v284_v36 = vsel %vm281_vm7, %v283_v31, %v279_v34 }
  0xbf   : > { %v285_v37 = vmul.f32 %v284_v36, %v260_v33 }
  0xc0   : > { %v394_v38 = vclamps-f32 %v231_v35, 1.0 }
  0xc1   : > { %v395_v39 = vclamps-f32 %v285_v37, 1.0 }
  0xc2   : > { %v234_v41 = vadd.f32 1.0, %v394_v38 }
  0xc3   : > { %v288_v42 = vadd.f32 1.0, %v395_v39  ;;  %297 = sbr.rel (!%p507_p4) target bundleno = 208 (0xd0), region = 36 }
  0xc4   : > { %v235_v43 = vmul.f32 %v234_v41, %v192_v40 }
  0xc5   : > { %v289_v44 = vmul.f32 %v288_v42, %v246_v28 }
  0xc6   : > { %236 = vst [vmem:[%s157_s5] sm:$0xff] %v235_v43 }
  0xc7   : > { %290 = vst [vmem:[%s157_s5 + $0x8] sm:$0xff] %v289_v44 }
  0xcd   : > { %v330_v29 = vld [vmem:[%s157_s5] sm:$0xff] }
  0xce   : > { %v332_v45 = vld [vmem:[%s157_s5 + $0x8] sm:$0xff]  ;;  %331 = vst [vmem:[%s299_s9] sm:$0xff] %v330_v29 }
  0xcf   : > { %333 = vst [vmem:[%s299_s9 + $0x18] sm:$0xff] %v332_v45 }
  0xd0 PF: > { %p10_p8 = scmp.ge.s32.totalorder %s497_s16, 5   ;;  %s562_s12 = smov %s453_s13 }
  0xd1   : > { %s563_s13 = smov %s505_s19  ;;  %s564_s14 = smov %s497_s16 }
  0xd2   :  { %12 = sbr.rel (!%p10_p8) target bundleno = 2 (0x2), region = 100 }

</bundles_post_ra>
